<compile_context>
chip_gen: v7x
topology: tpu7x:2x2x1
jax: 0.10.0
libtpu: 0.0.40
codegen_flags: <defaults>
</compile_context>

<pallas_src>
import jax
import jax.numpy as jnp
from jax.experimental import pallas as pl
from jax.experimental.pallas import tpu as pltpu

_LANE = 128


def _round_up(v: int, mult: int) -> int:
    return ((v + mult - 1) // mult) * mult


def _round_down(v: int, mult: int) -> int:
    return (v // mult) * mult


def _vmem_capacity_bytes() -> int:
    """Physical VMEM per TensorCore; conservative fallback when unknown."""
    try:
        info = pltpu.get_tpu_info()
        cap = int(getattr(info, "vmem_capacity_bytes", 0) or 0)
        if cap > 0:
            return cap
    except Exception:
        pass
    return 64 << 20  # v7x per-TC size: safe lower bound across v5e/v6e/v7x


def _get_m_fast_kernel(chat_ref, x_ref, o_ref):
    # Chat block is the full (k, n) parameter (one DMA, VMEM-resident);
    # x / o stream over the m axis in lane-dense tiles.
    o_ref[...] = jnp.dot(chat_ref[...], x_ref[...],
                         preferred_element_type=jnp.float32)


def _get_m_reduce_kernel(chat_ref, x_ref, o_ref):
    kk = pl.program_id(1)  # reduction (n) axis, innermost

    @pl.when(kk == 0)
    def _():
        o_ref[...] = jnp.zeros_like(o_ref)

    # Output block is resident across kk; accumulate into it directly.
    o_ref[...] += jnp.dot(chat_ref[...], x_ref[...],
                          preferred_element_type=jnp.float32)


def get_m_forward(chat: jax.Array, x: jax.Array, *,
                  stream_dtype=None, force_reduction: bool = False) -> jax.Array:
    """y = chat @ x, computed in a tiled Pallas TPU kernel.

    chat: (kmeansNum, n), x: (n, m) -> (kmeansNum, m) float32.
    stream_dtype: optionally cast inputs (e.g. jnp.bfloat16) to halve HBM
      traffic; accumulation and output stay float32.
    force_reduction: testing hook to exercise the large-n reduction path.
    """
    k, n = chat.shape
    n2, m = x.shape
    assert n == n2, "inner dims must match"

    if stream_dtype is not None:
        chat = chat.astype(stream_dtype)
        x = x.astype(stream_dtype)
    esz = jnp.dtype(chat.dtype).itemsize

    # Generation-aware VMEM budget: ~75% of physical (48 MiB on v7x,
    # 96 MiB on v5e/v6e), with extra headroom for compiler-internal scratch.
    vmem_limit = min((_vmem_capacity_bytes() * 3) // 4, 96 << 20)
    tile_budget = (vmem_limit * 4) // 5
    target_x_bytes = 8 << 20  # aim for ~8 MiB x DMA per grid step

    m128 = _round_up(m, _LANE)

    # Advisory cost estimate (unpadded problem) for XLA scheduling.
    cost = pl.CostEstimate(
        flops=2 * k * n * m,
        transcendentals=0,
        bytes_accessed=esz * (n * m + k * n) + 4 * k * m,
    )

    # ---------------- fast path: full Chat resident, 1-D grid over m ----------------
    fast_fixed = 2 * k * n * esz                    # Chat (double-buffered, worst case)
    fast_col_bytes = 2 * n * esz + 2 * k * 4        # per output column: x db + out db
    fast_ok = (fast_fixed + fast_col_bytes * _LANE) <= tile_budget

    if fast_ok and not force_reduction:
        max_tn_vmem = _round_down(
            max((tile_budget - fast_fixed) // fast_col_bytes, _LANE), _LANE)
        tn_target = _round_up(max(target_x_bytes // (n * esz), 1), _LANE)
        tn = max(_LANE, min(m128, max_tn_vmem, tn_target))
        # Keep >= 2 m-tiles (and >= 4 when m is large) so both v7x TCs get work.
        if m128 >= 2 * _LANE:
            tn = min(tn, max(_LANE, _round_down(m128 // 2, _LANE)))
        if m128 >= 4096:
            tn = min(tn, max(1024, _round_down(m128 // 4, _LANE)))

        m_pad = _round_up(m, tn)
        x_p = x if m_pad == m else jnp.pad(x, ((0, 0), (0, m_pad - m)))

        y = pl.pallas_call(
            _get_m_fast_kernel,
            out_shape=jax.ShapeDtypeStruct((k, m_pad), jnp.float32),
            grid_spec=pltpu.PrefetchScalarGridSpec(
                num_scalar_prefetch=0,
                grid=(m_pad // tn,),
                in_specs=[
                    # Full Chat, constant block index -> one DMA, truly resident.
                    pl.BlockSpec((k, n), lambda j: (0, 0)),
                    # x streamed in (n, tn) lane-dense tiles.
                    pl.BlockSpec((n, tn), lambda j: (0, j)),
                ],
                out_specs=pl.BlockSpec((k, tn), lambda j: (0, j)),
            ),
            compiler_params=pltpu.CompilerParams(
                dimension_semantics=("parallel",),
                vmem_limit_bytes=vmem_limit,
            ),
            cost_estimate=cost,
        )(chat, x_p)
        return y if m_pad == m else y[:, :m]

    # -------------- reduction path: n too large for a resident x slab --------------
    n128 = _round_up(n, _LANE)

    # m-axis tile: moderate lane width so the reduction tile can be deep.
    tn = max(_LANE, min(m128, 1024))
    if m128 >= 2 * _LANE:
        tn = min(tn, max(_LANE, _round_down(m128 // 2, _LANE)))

    # Reduction tile from remaining VMEM budget (x db + chat db + out db).
    fixed_out = 2 * k * tn * 4
    row_bytes = 2 * (tn + k) * esz
    tk_vmem = _round_down(
        max((tile_budget - fixed_out) // row_bytes, _LANE), _LANE)
    tk_target = _round_up(max(target_x_bytes // (tn * esz), 1), _LANE)
    tk = max(_LANE, min(n128, tk_vmem, tk_target))

    m_pad = _round_up(m, tn)
    n_pad = _round_up(n, tk)
    if n_pad != n:  # zero-padding the contraction dim is exact (adds 0 to sums)
        chat = jnp.pad(chat, ((0, 0), (0, n_pad - n)))
        x = jnp.pad(x, ((0, n_pad - n), (0, 0)))
    if m_pad != m:
        x = jnp.pad(x, ((0, 0), (0, m_pad - m)))

    y = pl.pallas_call(
        _get_m_reduce_kernel,
        out_shape=jax.ShapeDtypeStruct((k, m_pad), jnp.float32),
        grid_spec=pltpu.PrefetchScalarGridSpec(
            num_scalar_prefetch=0,
            grid=(m_pad // tn, n_pad // tk),  # reduction axis last
            in_specs=[
                pl.BlockSpec((k, tk), lambda j, kk: (0, kk)),
                pl.BlockSpec((tk, tn), lambda j, kk: (kk, j)),
            ],
            out_specs=pl.BlockSpec((k, tn), lambda j, kk: (0, j)),
        ),
        compiler_params=pltpu.CompilerParams(
            dimension_semantics=("parallel", "arbitrary"),
            vmem_limit_bytes=vmem_limit,
        ),
        cost_estimate=cost,
    )(chat, x)
    return y if m_pad == m else y[:, :m]


if __name__ == "__main__":
    # Module hyperparameters (small, consistent with the forward).
    kmeansNum = 8
    n = 32
    m = 256  # two lane-dense m tiles of 128

    # Deterministic parameter init: Chat = 1.0 * ones(kmeansNum, n), as in __init__.
    chat = jnp.ones((kmeansNum, n), dtype=jnp.float32)

    key = jax.random.PRNGKey(0)
    x = jax.random.normal(key, (n, m), dtype=jnp.float32)
    y_ref = chat @ x

    # Fast path (full-resident Chat, 1-D m grid).
    y = jax.block_until_ready(get_m_forward(chat, x))
    assert y.shape == (kmeansNum, m)
    assert jnp.allclose(y, y_ref, atol=1e-5, rtol=1e-5)

    # Padding path: m not a multiple of 128 is handled by host-side zero-pad.
    m_odd = 200
    x_odd = jax.random.normal(jax.random.PRNGKey(0), (n, m_odd), dtype=jnp.float32)
    y_odd = jax.block_until_ready(get_m_forward(chat, x_odd))
    assert y_odd.shape == (kmeansNum, m_odd)
    assert jnp.allclose(y_odd, chat @ x_odd, atol=1e-5, rtol=1e-5)

    # Reduction path (exercised via the testing hook; n is zero-padded to a tile).
    y_red = jax.block_until_ready(get_m_forward(chat, x, force_reduction=True))
    assert y_red.shape == (kmeansNum, m)
    assert jnp.allclose(y_red, y_ref, atol=1e-5, rtol=1e-5)

    print("KERNEL_OK")
</pallas_src>

<mosaic_0001>
module attributes {stable_mosaic.version = 11 : i64} {
  func.func @_get_m_fast_kernel(%arg0: i32, %arg1: memref<8x32xf32, #tpu.memory_space<vmem>>, %arg2: memref<32x128xf32, #tpu.memory_space<vmem>>, %arg3: memref<8x128xf32, #tpu.memory_space<vmem>>) attributes {dimension_semantics = [#tpu.dimension_semantics<parallel>], iteration_bounds = array<i64: 2>, scalar_prefetch = 0 : i64, scratch_operands = 0 : i64, tpu.core_type = #tpu.core_type<tc>, window_params = [{pipeline_mode = #tpu.pipeline_mode<synchronous>, transform_indices = @transform_0, window_bounds = array<i64: 8, 32>}, {transform_indices = @transform_1, window_bounds = array<i64: 32, 128>}, {transform_indices = @transform_2, window_bounds = array<i64: 8, 128>}]} {
    %c0 = arith.constant 0 : index
    %c0_0 = arith.constant 0 : index
    %0 = vector.load %arg1[%c0, %c0_0] : memref<8x32xf32, #tpu.memory_space<vmem>>, vector<8x32xf32>
    %c0_1 = arith.constant 0 : index
    %c0_2 = arith.constant 0 : index
    %1 = vector.load %arg2[%c0_1, %c0_2] : memref<32x128xf32, #tpu.memory_space<vmem>>, vector<32x128xf32>
    %cst = arith.constant dense<0.000000e+00> : vector<8x128xf32>
    %2 = tpu.matmul %0, %1, %cst {dimension_numbers = #tpu.dot_dimension_numbers<[1], [0], [0], [1], [0, 0, 1, 1], [], []>} : vector<8x32xf32>, vector<32x128xf32>, vector<8x128xf32> -> vector<8x128xf32>
    %c0_3 = arith.constant 0 : index
    %c0_4 = arith.constant 0 : index
    %3 = vector.load %arg3[%c0_3, %c0_4] : memref<8x128xf32, #tpu.memory_space<vmem>>, vector<8x128xf32>
    tpu.vector_store %arg3[%c0_3, %c0_4], %2 {strides = array<i32>} : memref<8x128xf32, #tpu.memory_space<vmem>>, vector<8x128xf32>,
    return
  }
  func.func @transform_0(%arg0: i32) -> (i32, i32) {
    %c0_i32 = arith.constant 0 : i32
    %c0_i32_0 = arith.constant 0 : i32
    %c0_i32_1 = arith.constant 0 : i32
    return %c0_i32, %c0_i32_0 : i32, i32
  }
  func.func @transform_1(%arg0: i32) -> (i32, i32) {
    %c0_i32 = arith.constant 0 : i32
    %c0_i32_0 = arith.constant 0 : i32
    return %c0_i32, %arg0 : i32, i32
  }
  func.func @transform_2(%arg0: i32) -> (i32, i32) {
    %c0_i32 = arith.constant 0 : i32
    %c0_i32_0 = arith.constant 0 : i32
    return %c0_i32, %arg0 : i32, i32
  }
}

</mosaic_0001>

<bundles_post_ra>
// kernel: tpu_custom_call.1
= control target key start
LH: loop header
LB: loop body
LE: loop exit
PB: predicated region body
PF: predicated region fallthrough
CT: control target
= control target key end

     0   :  { %7 = vsyncpa [#allocation3], 0  ;;  %s801_s0 = inlined_call_operand.hbm [shape: f32[8,32], index: 0, kind: input, shape index: {}]   ;;  %s802_s1 = inlined_call_operand.hbm [shape: f32[32,256], index: 1, kind: input, shape index: {}]   ;;  %s803_s2 = inlined_call_operand.hbm [shape: f32[8,256], index: 2, kind: output, shape index: {}]  }
   0x1   :  { %8 = vsyncpa [#allocation6], 0 }
   0x2   :  { %10 = vsyncpa [#allocation6 + $0x1], 0 }
   0x3   :  { %11 = vsyncpa [#allocation4], 0 }
   0x4   :  { %13 = vsyncpa [#allocation4 + $0x1], 0  ;;  %s604_s9 = smov 0   ;;  %s606_s10 = smov 0  }
   0x5   :  { %s608_s11 = smov 0   ;;  %s610_s12 = smov 0  }
   0x6 LB: > { %s625_s13 = sadd.s32 4294967295, %s578_s12   ;;  %s350_s14 = sadd.s32 4294967294, %s578_s12   ;;  %s578_s12 = sphi %s610_s12, %s828_s12   ;;  %s574_s11 = sphi %s608_s11, %s827_s11   ;;  %s570_s10 = sphi %s606_s10, %s826_s10   ;;  %s566_s9 = sphi %s604_s9, %s825_s9  }
   0x7   : > { %s629_s15 = sadd.s32 1, %s578_s12   ;;  %s47_s16 = sadd.s32 1, %s574_s11 }
   0x8   : > { %s44_s17 = ssub.s32 %s578_s12, %s629_s15  ;;  %p54_p0 = scmp.ne.s32.totalorder %s574_s11, %s570_s10 }
   0x9   : > { %p45_p1 = scmp.eq.s32.totalorder %s44_s17, 0  ;;  %p55_p2 = scmp.eq.s32.totalorder %s578_s12, 0 }
   0xa   : > { %p60_p3 = scmp.ne.s32.totalorder %s570_s10, %s566_s9  ;;  %p804_p4 = scmp.eq.s32.totalorder %s625_s13, 0 }
   0xb   : > { %s641_s18 = scalar_select %p45_p1, %s574_s11, %s47_s16  }
   0xc   : > { %p643_p5 = por %p55_p2, %p54_p0  ;;  %p649_p6 = por %p804_p4, %p60_p3 }
   0xd   : > { %p84_p7 = scmp.eq.s32.totalorder %s625_s13, 1  ;;  %p90_p8 = scmp.eq.s32.totalorder %s350_s14, 1 }
   0xe   : > { %s810_s20 = scalar_select %p649_p6, 1, 0 }
   0xf   : > { %p351_p9 = scmp.ge.s32.totalorder %s578_s12, 1  ;;  %p97_p10 = scmp.lt.s32.totalorder %s578_s12, 3 }
  0x10   : > { %p656_p11 = por %p84_p7, %p54_p0  ;;  %p660_p12 = por %p90_p8, %p60_p3 }
  0x11   : > { %p664_p13 = pnand %p351_p9, %p97_p10  ;;  %s580_s24 = smov [#allocation2]  }
  0x12   : > { %s811_s21 = scalar_select %p656_p11, 1, 0 }
  0x13   : > { %s812_s22 = scalar_select %p660_p12, 1, 0 }
  0x14   : > { %s813_s23 = scalar_select %p664_p13, 1, 0 }
  0x15   : > { %p395_p2 = pneg %p664_p13  ;;  %s110_s25 = sshll.u32 %s580_s24, 4  ;;  %s111_s25 = int_to_ptr.vmem [resolvable:$true] %s110_s25 }
  0x16   : > { %p408_p4 = scmp.lt.s32.totalorder %s578_s12, 2  ;;  %p814_p0 = scmp.eq.s32.totalorder %s625_s13, 0 }
  0x17   : > { %s121_s27 = sand.u32 1, %s574_s11   ;;  %s450_s4 = scalar_lea.hbm %s801_s0, 128 }
  0x18   : > { %p674_p7 = pnand %p395_p2, %p814_p0  ;;  %p681_p3 = pnand %p408_p4, %p643_p5 }
  0x19   : > { %s354_s29 = sshll.u32 %s121_s27, 5  ;;  %p451_p8 = scmp.ne.s32.totalorder %s801_s0, %s450_s4 }
  0x1a   : > { %s816_s28 = scalar_select %p681_p3, 1, 0 }
  0x1b   : > { %p452_p9 = pneg %p674_p7  ;;  %p457_p4 = scmp.lt.u32.totalorder %s450_s4, %s801_s0 }
  0x1d   : > { %p453_p10 = pnand %p452_p9, %p451_p8 }
  0x1f   : > { %p454_p2 = pneg %p453_p10 }
  0x21   : > { %p459_p5 = pnand %p457_p4, %p454_p2 }
  0x23   : > { %462 = shalt.err (!%p459_p5)
}
  0x24   : > { %s463_s14 = scalar_lea.vmem %s111_s25, 128  ;;  %p471_p11 = scmp.lt.s32.totalorder %s111_s25, %s111_s25 }
  0x25   : > { %p464_p0 = scmp.ne.s32.totalorder %s111_s25, %s463_s14  ;;  %p472_p6 = scmp.lt.s32.totalorder %s463_s14, %s463_s14 }
  0x27   : > { %p466_p1 = pnand %p464_p0, %p452_p9  ;;  %p473_p13 = por %p472_p6, %p471_p11 }
  0x29   : > { %p467_p12 = pneg %p466_p1 }
  0x2b   : > { %p474_p3 = pnand %p473_p13, %p467_p12 }
  0x2d   : > { %477 = shalt.err (!%p474_p3)
}
  0x2e   : > { %398 = dma.hbm_to_vmem [thread:$0]  (!%p674_p7), %s801_s0, 128, %s111_s25, [#allocation3]  }
  0x2f   : > { %s355_s19 = sshll.u32 %s578_s12, 7  ;;  %s125_s24 = scalar_lea.vmem [#allocation5], %s354_s29 }
  0x30   : > { %s131_s30 = sshll.u32 %s125_s24, 4  ;;  %s705_s5 = scalar_lea.hbm %s802_s1, %s355_s19  ;;  %s707_s30 = int_to_ptr.vmem [resolvable:$true] %s131_s30 }
  0x31   : > { %s709_s26 = scalar_lea.sflag [#allocation6], %s121_s27  ;;  %s478_s6 = scalar_lea.hbm %s705_s5, 512 }
  0x32   : > { %p479_p6 = scmp.ne.s32.totalorder %s705_s5, %s478_s6  ;;  %p817_p11 = scmp.ne.s32.totalorder %s816_s28, 0 }
  0x33   : > { %s483_s7 = scalar_lea.hbm %s802_s1, 1024  ;;  %p484_p7 = scmp.lt.u32.totalorder %s705_s5, %s802_s1 }
  0x34   : > { %p480_p12 = pneg %p817_p11  ;;  %p485_p3 = scmp.lt.u32.totalorder %s483_s7, %s478_s6 }
  0x35   : > { %p487_p9 = scmp.lt.u32.totalorder %s478_s6, %s705_s5 }
  0x36   : > { %p481_p13 = pnand %p480_p12, %p479_p6  ;;  %p486_p8 = por %p485_p3, %p484_p7 }
  0x38   : > { %p482_p1 = pneg %p481_p13  ;;  %p488_p10 = por %p487_p9, %p486_p8 }
  0x3a   : > { %p489_p2 = pnand %p488_p10, %p482_p1 }
  0x3c   : > { %492 = shalt.err (!%p489_p2)
}
  0x3d   : > { %s493_s27 = scalar_lea.vmem %s707_s30, 512  ;;  %s581_s16 = smov [#allocation5]  }
  0x3e   : > { %p494_p4 = scmp.ne.s32.totalorder %s707_s30, %s493_s27  ;;  %s498_s17 = sshll.u32 %s581_s16, 4  ;;  %s499_s17 = int_to_ptr.vmem [resolvable:$false] %s498_s17 }
  0x3f   : > { %s500_s19 = scalar_lea.vmem %s499_s17, 1024  ;;  %p501_p6 = scmp.lt.s32.totalorder %s707_s30, %s499_s17 }
  0x40   : > { %p496_p5 = pnand %p494_p4, %p480_p12  ;;  %p502_p13 = scmp.lt.s32.totalorder %s500_s19, %s493_s27 }
  0x42   : > { %p497_p0 = pneg %p496_p5  ;;  %p503_p7 = por %p502_p13, %p501_p6 }
  0x44   : > { %p504_p3 = pnand %p503_p7, %p497_p0 }
  0x46   : > { %507 = shalt.err (!%p504_p3)
}
  0x47   : > { %s582_s24 = smov 256   ;;  %s583_s3 = smov 128  }
  0x48   : > { %s584_s4 = smov 8   ;;  %p818_p12 = scmp.ne.s32.totalorder %s813_s23, 0 }
  0x49   : > { %402 = dma.hbm_to_vmem [thread:$0]  (!%p817_p11), %s705_s5, 512, %s707_s30, %s709_s26, %s582_s24, %s583_s3, %s584_s4  }
  0x4a   : > { %143 = sbr.rel (%p818_p12) target bundleno = 322 (0x142), region = 28  ;;  %p819_p1 = scmp.eq.s32.totalorder (!%p818_p12), %s625_s13, 0 }
  0x51   : > { %553 = dma.done.wait (%p819_p1), [#allocation3], 128   ;;  %p820_p8 = pmov %p819_p1 }
  0x52   : > { %s744_s6 = sand.u32 1, %s570_s10   ;;  %p821_p9 = scmp.ne.s32.totalorder %s810_s20, 0 }
  0x53   : > { %555 = vsyncadd (%p820_p8), [#allocation3], 4294967168  ;;  %s358_s25 = sshll.u32 %s744_s6, 5  ;;  %s150_s29 = scalar_lea.sflag [#allocation6], %s744_s6 }
  0x54   : > { %s153_s7 = scalar_lea.vmem [#allocation5], %s358_s25 }
  0x55   : > { %557 = dma.done.wait (%p821_p9), %s150_s29, 512  }
  0x56   : > { %559 = vsyncadd (%p821_p9), %s150_s29, 4294966784  ;;  %v585_v0 = vmov 0.0|0.0   ;;  %vm586_vm0 = vmmov 0   ;;  %v587_v1 = vmov 0.0   ;;  %v175_v2 = vld [vmem:[%s153_s7] sm:$0xff]  ;;  %v176_v3 = vld [vmem:[%s153_s7 + $0x8] sm:$0xff] }
  0x57   : > { %381 = vmatprep.subr.bf16.mxu0 %v585_v0  ;;  %378 = vmatprep.mubr.msk.f32.mxu0 %vm586_vm0, %v587_v1  ;;  %v177_v4 = vld [vmem:[%s153_s7 + $0x10] sm:$0xff]  ;;  %v382_v5 = vpack.c.bf16 %v176_v3, %v175_v2  ;;  %v178_v6 = vld [vmem:[%s153_s7 + $0x18] sm:$0xff]  ;;  %vm179_vm1 = vcmask 261120   ;;  %s359_s20 = sshll.u32 %s744_s6, 3  ;;  %s362_s30 = sshll.u32 %s625_s13, 7 }
  0x58   : > { %v385_v7 = vpack.c.bf16 %v178_v6, %v177_v4  ;;  %v174_v8 = vld [vmem:[#allocation2] sm:$0xff]  ;;  %s173_s23 = scalar_lea.vmem [#allocation7], %s359_s20  ;;  %s759_s8 = scalar_lea.hbm %s803_s2, %s362_s30 }
  0x59   : > { %383 = vmatpush3.bf16.msra.mxu0 %v382_v5  ;;  %s268_s28 = sshll.u32 %s173_s23, 4  ;;  %s255_s14 = scalar_lea.sflag [#allocation4], %s744_s6  ;;  %s754_s28 = int_to_ptr.vmem [resolvable:$true] %s268_s28 }
  0x5a   : > { %384 = vmatprep.subr.bf16.mxu0 %v585_v0  ;;  %s508_s27 = scalar_lea.vmem %s754_s28, 128  ;;  %p822_p10 = scmp.ne.s32.totalorder %s811_s21, 0 }
  0x5b   : > { %p509_p11 = scmp.ne.s32.totalorder %s754_s28, %s508_s27  ;;  %s588_s13 = smov [#allocation7]  }
  0x5c   : > { %s512_s16 = sshll.u32 %s588_s13, 4  ;;  %s513_s16 = int_to_ptr.vmem [resolvable:$false] %s512_s16 }
  0x5d   : > { %386 = vmatpush3.bf16.msra.mxu0 %v385_v7  ;;  %p510_p2 = pnand %p509_p11, %p822_p10  ;;  %s514_s17 = scalar_lea.vmem %s513_s16, 256 }
  0x5e   : > { %p515_p5 = scmp.lt.s32.totalorder %s754_s28, %s513_s16  ;;  %p516_p0 = scmp.lt.s32.totalorder %s514_s17, %s508_s27 }
  0x5f   : > { %p511_p4 = pneg %p510_p2 }
  0x60   : > { %379 = vmatmul.mubr.msk.f32.vlgmr.msra.gmra.mrb[0].mxu0 %vm179_vm1, %v174_v8  ;;  %p517_p6 = por %p516_p0, %p515_p5 }
  0x62   : > { %p518_p13 = pnand %p517_p6, %p511_p4 }
 0x133   : > { %v249_v9 = vpop.f32.mrb[0].mxu0 }
 0x134   : > { %253 = vst [vmem:[%s173_s23] sm:$0xff] %v249_v9  ;;  %v380_v10 = vpop.f32.mrb[1].mxu0 }
 0x135   : > { %521 = shalt.err (!%p518_p13)
}
 0x136   : > { %s522_s19 = scalar_lea.hbm %s759_s8, 128  ;;  %s526_s4 = scalar_lea.hbm %s803_s2, 256 }
 0x137   : > { %p523_p7 = scmp.ne.s32.totalorder %s759_s8, %s522_s19  ;;  %p527_p1 = scmp.lt.u32.totalorder %s759_s8, %s803_s2 }
 0x138   : > { %p528_p8 = scmp.lt.u32.totalorder %s526_s4, %s522_s19  ;;  %p530_p11 = scmp.lt.u32.totalorder %s522_s19, %s759_s8 }
 0x139   : > { %p524_p3 = pnand %p523_p7, %p822_p10 }
 0x13a   : > { %p529_p9 = por %p528_p8, %p527_p1 }
 0x13b   : > { %p525_p12 = pneg %p524_p3 }
 0x13c   : > { %p531_p2 = por %p530_p11, %p529_p9 }
 0x13e   : > { %p532_p4 = pnand %p531_p2, %p525_p12 }
 0x140   : > { %535 = shalt.err (!%p532_p4)
}
 0x141   : > { %393 = dma.vmem_to_hbm [thread:$0]  (%p822_p10), %s754_s28, 128, %s759_s8, %s255_s14  }
 0x142 PF: > { %s280_s29 = sand.u32 1, %s566_s9   ;;  %p823_p5 = scmp.ne.s32.totalorder %s812_s22, 0 }
 0x143   : > { %p824_p0 = scmp.ge.s32.totalorder %s578_s12, 2  ;;  %s281_s7 = scalar_lea.sflag [#allocation4], %s280_s29 }
 0x145   : > { %p404_p6 = pnand %p824_p0, %p823_p5 }
 0x147   : > { %561 = dma.done.wait (!%p404_p6), %s281_s7, 128  }
 0x148   : > { %563 = vsyncadd (!%p404_p6), %s281_s7, 4294967168  ;;  %p16_p13 = scmp.ge.s32.totalorder %s629_s15, 4   ;;  %s825_s9 = smov %s570_s10 }
 0x149   : > { %s826_s10 = smov %s574_s11  ;;  %s827_s11 = smov %s641_s18 }
 0x14a   : > { %s828_s12 = smov %s629_s15  ;;  %18 = sbr.rel (!%p16_p13) target bundleno = 6 (0x6), region = 78 }
 0x151   :  { %286 = vsyncpa [#allocation3], 1 }
 0x152   :  { %288 = vsyncpa [#allocation3 + $0x1], 1 }
 0x153   :  { %289 = vsyncpa [#allocation6], 1 }
 0x154   :  { %291 = vsyncpa [#allocation6 + $0x1], 1 }
 0x155   :  { %292 = vsyncpa [#allocation4], 1 }
 0x156   :  { %294 = vsyncpa [#allocation4 + $0x1], 1 }

</bundles_post_ra>
